<compile_context>
chip_gen: v5e
topology: v5e:2x2
jax: 0.10.0
libtpu: 0.0.40
codegen_flags: <defaults>
</compile_context>

<pallas_src>
import jax
import jax.numpy as jnp
from jax.experimental import pallas as pl
from jax.experimental.pallas import tpu as pltpu

LANES = 128        # vreg lane width
ROW_TILE = 2048    # max rows (of 128 lanes) per grid step


def _fused_mlp_softmax_kernel(s_ref, x_ref, p0_ref):
    """p0 = sigmoid(-(a*x + c)) computed as 0.5 - 0.5*tanh(a2*x + c2).

    s_ref  : SMEM (2,) f32 -- [a2, c2] where a2 = 0.5*a, c2 = 0.5*c (pre-halved)
    x_ref  : VMEM (TR, 128) f32 -- lane-dense input scalars
    p0_ref : VMEM (TR, 128) f32 -- class-0 probabilities (p1 = 1 - p0 in wrapper)
    """
    t = s_ref[0] * x_ref[...] + s_ref[1]
    p0_ref[...] = 0.5 - 0.5 * jnp.tanh(t)


def init_params(key):
    """Deterministic init of fc1 (1->3) and fc2 (3->2), PyTorch Linear layout."""
    k1, k2, k3, k4 = jax.random.split(key, 4)
    w1 = jax.random.uniform(k1, (3, 1), jnp.float32, -1.0, 1.0)   # (out, in)
    b1 = jax.random.uniform(k2, (3,), jnp.float32, -1.0, 1.0)
    w2 = jax.random.uniform(k3, (2, 3), jnp.float32, -1.0, 1.0)
    b2 = jax.random.uniform(k4, (2,), jnp.float32, -1.0, 1.0)
    return w1, b1, w2, b2


def _round_up(n, k):
    return ((n + k - 1) // k) * k


def mynet_forward(params, *inp):
    """Equivalent of mynet.forward(*inp): stack -> fc1 -> fc2 -> softmax -> view(-1, 2)."""
    w1, b1, w2, b2 = params

    # torch.stack(inp) -> (n_inp, B, 1); last dim is 1, so flatten to M scalars.
    x_flat = jnp.stack(inp).astype(jnp.float32).reshape(-1)
    m = x_flat.shape[0]

    # Fold fc1/fc2/softmax into two scalars: logit gap l1 - l0 = a*x + c
    # (exact: affine∘affine before the 2-class softmax). Pre-halve for tanh form.
    dw = (w2[1] - w2[0]).astype(jnp.float32)                        # (3,)
    a = jnp.dot(dw, w1[:, 0].astype(jnp.float32))                   # scalar
    c = jnp.dot(dw, b1.astype(jnp.float32)) + (b2[1] - b2[0])       # scalar
    scalars = jnp.stack([0.5 * a, 0.5 * c]).astype(jnp.float32)     # [a/2, c/2]

    # Lane-dense layout: (rows, 128), rows rounded only up to a multiple of 8.
    rows = max(pl.cdiv(m, LANES), 1)
    rows = _round_up(rows, 8)
    if rows <= 8:
        tr = rows                                   # single tiny tile
    else:
        # >=2 grid steps (so v7x's 2nd TensorCore gets work), capped at ROW_TILE.
        tr = min(ROW_TILE, _round_up(pl.cdiv(rows, 2), 8))
    grid = pl.cdiv(rows, tr)

    pad = rows * LANES - m
    x2d = (jnp.pad(x_flat, (0, pad)) if pad else x_flat).reshape(rows, LANES)

    p0 = pl.pallas_call(
        _fused_mlp_softmax_kernel,
        grid=(grid,),
        out_shape=jax.ShapeDtypeStruct((rows, LANES), jnp.float32),
        in_specs=[
            pl.BlockSpec(memory_space=pltpu.MemorySpace.SMEM),   # [a/2, c/2]
            pl.BlockSpec((tr, LANES), lambda i: (i, 0)),          # lane-dense input tile
        ],
        out_specs=pl.BlockSpec((tr, LANES), lambda i: (i, 0)),
        compiler_params=pltpu.CompilerParams(
            dimension_semantics=("parallel",)),
    )(scalars, x2d)

    # Trim padding and interleave into (-1, 2); the 1-p0 fuses into this stack.
    p0_flat = p0.reshape(-1)[:m]
    return jnp.stack([p0_flat, 1.0 - p0_flat], axis=-1)


if __name__ == "__main__":
    key = jax.random.PRNGKey(0)
    pkey, xkey1, xkey2 = jax.random.split(key, 3)
    params = init_params(pkey)

    # two positional inputs (as in forward(*inp)), each (batch=8, 1)
    inp_a = jax.random.normal(xkey1, (8, 1), jnp.float32)
    inp_b = jax.random.normal(xkey2, (8, 1), jnp.float32)

    out = mynet_forward(params, inp_a, inp_b)
    out = jax.block_until_ready(out)

    # pure-JAX reference of the PyTorch forward
    w1, b1, w2, b2 = params
    xs = jnp.stack([inp_a, inp_b]).astype(jnp.float32)              # (2, 8, 1)
    ref = jax.nn.softmax((xs @ w1.T + b1) @ w2.T + b2, axis=-1).reshape(-1, 2)

    assert out.shape == (16, 2)
    assert bool(jnp.all(jnp.abs(jnp.sum(out, axis=-1) - 1.0) < 1e-5))
    assert bool(jnp.all(jnp.abs(out - ref) < 2e-3))
    print("KERNEL_OK")
</pallas_src>

<mosaic_0001>
module attributes {stable_mosaic.version = 11 : i64} {
  func.func @_fused_mlp_softmax_kernel(%arg0: i32, %arg1: memref<2xf32, #tpu.memory_space<smem>>, %arg2: memref<8x128xf32, #tpu.memory_space<vmem>>, %arg3: memref<8x128xf32, #tpu.memory_space<vmem>>) attributes {dimension_semantics = [#tpu.dimension_semantics<parallel>], iteration_bounds = array<i64: 1>, scalar_prefetch = 0 : i64, scratch_operands = 0 : i64, tpu.core_type = #tpu.core_type<tc>, window_params = [{transform_indices = @transform_0, window_bounds = array<i64: 2>}, {transform_indices = @transform_1, window_bounds = array<i64: 8, 128>}, {transform_indices = @transform_2, window_bounds = array<i64: 8, 128>}]} {
    %c0 = arith.constant 0 : index
    %0 = memref.load %arg1[%c0] : memref<2xf32, #tpu.memory_space<smem>>
    %c0_0 = arith.constant 0 : index
    %c0_1 = arith.constant 0 : index
    %1 = vector.load %arg2[%c0_0, %c0_1] : memref<8x128xf32, #tpu.memory_space<vmem>>, vector<8x128xf32>
    %2 = vector.broadcast %0 : f32 to vector<8x128xf32>
    %3 = arith.mulf %2, %1 : vector<8x128xf32>
    %c1 = arith.constant 1 : index
    %4 = memref.load %arg1[%c1] : memref<2xf32, #tpu.memory_space<smem>>
    %5 = vector.broadcast %4 : f32 to vector<8x128xf32>
    %6 = arith.addf %3, %5 : vector<8x128xf32>
    %7 = math.tanh %6 : vector<8x128xf32>
    %cst = arith.constant 5.000000e-01 : f32
    %8 = vector.broadcast %cst : f32 to vector<8x128xf32>
    %9 = arith.mulf %8, %7 : vector<8x128xf32>
    %cst_2 = arith.constant 5.000000e-01 : f32
    %10 = vector.broadcast %cst_2 : f32 to vector<8x128xf32>
    %11 = arith.subf %10, %9 : vector<8x128xf32>
    %c0_3 = arith.constant 0 : index
    %c0_4 = arith.constant 0 : index
    %12 = vector.load %arg3[%c0_3, %c0_4] : memref<8x128xf32, #tpu.memory_space<vmem>>, vector<8x128xf32>
    tpu.vector_store %arg3[%c0_3, %c0_4], %11 {strides = array<i32>} : memref<8x128xf32, #tpu.memory_space<vmem>>, vector<8x128xf32>,
    return
  }
  func.func @transform_0(%arg0: i32) -> i32 {
    %c0_i32 = arith.constant 0 : i32
    %c0_i32_0 = arith.constant 0 : i32
    return %c0_i32 : i32
  }
  func.func @transform_1(%arg0: i32) -> (i32, i32) {
    %c0_i32 = arith.constant 0 : i32
    %c0_i32_0 = arith.constant 0 : i32
    return %arg0, %c0_i32 : i32, i32
  }
  func.func @transform_2(%arg0: i32) -> (i32, i32) {
    %c0_i32 = arith.constant 0 : i32
    %c0_i32_0 = arith.constant 0 : i32
    return %arg0, %c0_i32 : i32, i32
  }
}

</mosaic_0001>

<bundles_post_ra>
// kernel: tpu_custom_call.1
= control target key start
LH: loop header
LB: loop body
LE: loop exit
PB: predicated region body
PF: predicated region fallthrough
CT: control target
= control target key end

     0   :  { %7 = vsyncpa [#allocation5], 0  ;;  %s167_s0 = inlined_call_operand.hbm [shape: f32[2], index: 0, kind: input, shape index: {}]   ;;  %s168_s1 = inlined_call_operand.hbm [shape: f32[8,128], index: 1, kind: input, shape index: {}]   ;;  %s169_s2 = inlined_call_operand.hbm [shape: f32[8,128], index: 2, kind: output, shape index: {}]  }
   0x1   :  { %8 = vsyncpa [#allocation3], 0 }
   0x2   :  { %9 = vsyncpa [#allocation4], 0  ;;  %s15_s11 = sshll.u32 %s167_s0, 4  ;;  %s24_s14 = sshll.u32 %s168_s1, 4  ;;  %s16_s11 = int_to_ptr.hbm [resolvable:$true] %s15_s11  ;;  %s25_s14 = int_to_ptr.hbm [resolvable:$true] %s24_s14 }
   0x3   :  { %s140_s15 = smov [#allocation2]   ;;  %s141_s16 = smov [#allocation6]  }
   0x4   :  { %18 = dma.hbm_to_smem %s16_s11, 16, %s140_s15, [#allocation5]  }
   0x5   :  { %s26_s17 = sshll.u32 %s141_s16, 4  ;;  %s27_s17 = int_to_ptr.vmem [resolvable:$true] %s26_s17 }
   0x6   :  { %29 = dma.hbm_to_vmem [thread:$0]  %s25_s14, 128, %s27_s17, [#allocation3]  }
   0x7   :  { %134 = dma.done.wait [#allocation5], 16  }
   0x8   :  { %135 = vsyncadd [#allocation5], 4294967280 }
   0x9   :  { %136 = dma.done.wait [#allocation3], 128  }
   0xa   :  { %137 = vsyncadd [#allocation3], 4294967168 }
   0xb   :  { %38 = sfence }
   0xc   :  { %s39_s18 = sld [smem:[#allocation2]]  ;;  %v40_v0 = vld [vmem:[#allocation6] sm:$0xff]  ;;  %s142_s0 = smov [#allocation7]  }
   0xd   :  { %s68_s19 = sld [smem:[#allocation2 + $0x1]]  ;;  %s55_s1 = sshll.u32 %s142_s0, 4  ;;  %s56_s1 = int_to_ptr.vmem [resolvable:$true] %s55_s1 }
   0xe   :  { %s57_s22 = sshll.u32 %s169_s2, 4  ;;  %s58_s22 = int_to_ptr.hbm [resolvable:$true] %s57_s22 }
  0x12   :  { %v41_v1 = vstv %s39_s18 }
  0x13   :  { %v42_v2 = vmul.f32 %v41_v1, %v40_v0  ;;  %v44_v3 = vstv %s68_s19 }
  0x15   :  { %v45_v4 = vadd.f32 %v44_v3, %v42_v2 }
  0x17   :  { %72 = vtanh.f32 %v45_v4 }
  0x1d   :  { %v73_v5 = vpop.eup %72 }
  0x1e   :  { %v47_v6 = vmul.f32 0.5, %v73_v5 }
  0x20   :  { %v48_v7 = vsub.f32 0.5, %v47_v6 }
  0x22   :  { %49 = vst [vmem:[#allocation7] sm:$0xff] %v48_v7 }
  0x23   :  { %60 = dma.vmem_to_hbm [thread:$0]  %s56_s1, 128, %s58_s22, [#allocation4]  }
  0x24   :  { %138 = dma.done.wait [#allocation4], 128  }
  0x25   :  { %139 = vsyncadd [#allocation4], 4294967168 }
  0x26   :  { %65 = vsyncpa [#allocation3], 1 }
  0x27   :  { %66 = vsyncpa [#allocation4], 1 }
  0x28   :  { %67 = vsyncpa [#allocation5], 1 }

</bundles_post_ra>
